<compile_context>
chip_gen: v6e
topology: v6e:2x2x1
jax: 0.10.0
libtpu: 0.0.40
codegen_flags: <defaults>
</compile_context>

<pallas_src>
import jax
import jax.numpy as jnp
from jax.experimental import pallas as pl
from jax.experimental.pallas import tpu as pltpu


def _make_lstm_kernel(B: int, T: int, H: int):
    """Kernel closed over static batch (B), sequence (T) and hidden (H) sizes."""

    def kernel(x_ref, wx_ref, wh_ref, b_ref, wfc_ref, bfc_ref, out_ref, h_scr):
        # x_ref:   (T*B, D)    time-major flattened embeddings
        # wx_ref:  (D, 4H)     fused W_ih^T   (gate order i | f | g | o along lanes)
        # wh_ref:  (H, 4H)     fused W_hh^T
        # b_ref:   (1, 4H)     fused (b_ih + b_hh)
        # wfc_ref: (H, O)      W_fc^T
        # bfc_ref: (1, O)      b_fc
        # out_ref: (T*B, O)    time-major flattened output
        # h_scr:   (T*B, H)    VMEM scratch accumulating per-step hidden states

        # --- hoisted input projection: one fat lane-dense matmul, no serial dep.
        gx = (jnp.dot(x_ref[...], wx_ref[...], preferred_element_type=jnp.float32)
              + b_ref[...])                                          # (T*B, 4H)

        wh = wh_ref[...]                                             # (H, 4H)

        # lane-quadrant mask: gate g (tanh) occupies lanes [2H, 3H)
        lane = jax.lax.broadcasted_iota(jnp.int32, (B, 4 * H), 1)
        is_g = jnp.logical_and(lane >= 2 * H, lane < 3 * H)

        h = jnp.zeros((B, H), jnp.float32)                           # init_hidden -> zeros
        c = jnp.zeros((B, H), jnp.float32)

        # --- recurrence: statically unrolled; ONE MXU push + 2 EUP pushes per step
        # (plus tanh(c)) on the serial chain.
        for t in range(T):
            r0 = t * B
            gates = gx[r0:r0 + B, :] + jnp.dot(
                h, wh, preferred_element_type=jnp.float32)           # (B, 4H)

            act = jnp.where(is_g, jnp.tanh(gates), jax.nn.sigmoid(gates))
            i_g = act[:, 0 * H:1 * H]
            f_g = act[:, 1 * H:2 * H]
            g_g = act[:, 2 * H:3 * H]
            o_g = act[:, 3 * H:4 * H]

            c = f_g * c + i_g * g_g
            h = o_g * jnp.tanh(c)
            h_scr[r0:r0 + B, :] = h                                  # bound live range

        # --- single fc matmul over all timesteps; lane-dense (O=128) store burst.
        out = (jnp.dot(h_scr[...], wfc_ref[...], preferred_element_type=jnp.float32)
               + bfc_ref[...])
        out_ref[...] = out.astype(out_ref.dtype)

    return kernel


def prepare_lstm_weights(w_ih, w_hh, b_ih, b_hh, w_fc, b_fc):
    """One-time (model-init) re-layout of the PyTorch parameters.

    Hoisted out of the per-call jit so forward pays zero re-layout cost.
    """
    H4, D = w_ih.shape
    H = w_hh.shape[1]
    O = w_fc.shape[0]
    assert H4 == 4 * H
    wx = jnp.transpose(w_ih)                 # (D, 4H)   lanes ordered i|f|g|o
    wh = jnp.transpose(w_hh)                 # (H, 4H)
    b = (b_ih + b_hh).reshape(1, 4 * H)      # (1, 4H)
    wfc = jnp.transpose(w_fc)                # (H, O)
    bfc = b_fc.reshape(1, O)                 # (1, O)
    return wx, wh, b, wfc, bfc


@jax.jit
def lstm_forward(x, wx, wh, b, wfc, bfc):
    """x: (B, T, D) float32 (batch_first, like PyTorch). Returns (B, T, O)."""
    B, T, D = x.shape
    H = wh.shape[0]
    O = wfc.shape[1]

    # Time-major flatten: step t occupies rows [t*B, (t+1)*B) — aligned sublane block.
    x_tm = jnp.transpose(x, (1, 0, 2)).reshape(T * B, D)

    vmem_spec = pl.BlockSpec(memory_space=pltpu.MemorySpace.VMEM)
    out_tm = pl.pallas_call(
        _make_lstm_kernel(B, T, H),
        out_shape=jax.ShapeDtypeStruct((T * B, O), jnp.float32),
        in_specs=[vmem_spec] * 6,
        out_specs=vmem_spec,
        scratch_shapes=[pltpu.VMEM((T * B, H), jnp.float32)],
    )(x_tm, wx, wh, b, wfc, bfc)

    return jnp.transpose(out_tm.reshape(T, B, O), (1, 0, 2))  # back to (B, T, O)


def lstm_reference(x, w_ih, w_hh, b_ih, b_hh, w_fc, b_fc):
    """Pure-JAX reference of PyTorch nn.LSTM(batch_first) + nn.Linear."""
    B, T, D = x.shape
    H = w_hh.shape[1]

    def step(carry, x_t):
        h, c = carry
        gates = x_t @ w_ih.T + h @ w_hh.T + b_ih + b_hh
        i = jax.nn.sigmoid(gates[:, 0 * H:1 * H])
        f = jax.nn.sigmoid(gates[:, 1 * H:2 * H])
        g = jnp.tanh(gates[:, 2 * H:3 * H])
        o = jax.nn.sigmoid(gates[:, 3 * H:4 * H])
        c = f * c + i * g
        h = o * jnp.tanh(c)
        return (h, c), h

    h0 = jnp.zeros((B, H), jnp.float32)
    c0 = jnp.zeros((B, H), jnp.float32)
    _, hs = jax.lax.scan(step, (h0, c0), jnp.transpose(x, (1, 0, 2)))
    hs = jnp.transpose(hs, (1, 0, 2))           # (B, T, H)
    return hs @ w_fc.T + b_fc


if __name__ == "__main__":
    # Shapes implied by the module: batch=8, seq(look_back)=8,
    # input_size(emb_length)=32, hidden_dim=32, output_size(num_items)=128.
    B, T, D, H, O = 8, 8, 32, 32, 128

    key = jax.random.PRNGKey(0)
    ks = jax.random.split(key, 7)
    scale = 1.0 / jnp.sqrt(H)
    x = jax.random.normal(ks[0], (B, T, D), jnp.float32)           # item_emb(seqs)
    w_ih = jax.random.uniform(ks[1], (4 * H, D), jnp.float32, -scale, scale)
    w_hh = jax.random.uniform(ks[2], (4 * H, H), jnp.float32, -scale, scale)
    b_ih = jax.random.uniform(ks[3], (4 * H,), jnp.float32, -scale, scale)
    b_hh = jax.random.uniform(ks[4], (4 * H,), jnp.float32, -scale, scale)
    w_fc = jax.random.uniform(ks[5], (O, H), jnp.float32, -scale, scale)
    b_fc = jax.random.uniform(ks[6], (O,), jnp.float32, -scale, scale)

    # One-time weight layout prep (outside the per-call jit).
    wx, wh, b, wfc, bfc = prepare_lstm_weights(w_ih, w_hh, b_ih, b_hh, w_fc, b_fc)

    out = jax.block_until_ready(lstm_forward(x, wx, wh, b, wfc, bfc))
    ref = lstm_reference(x, w_ih, w_hh, b_ih, b_hh, w_fc, b_fc)

    assert out.shape == (B, T, O)
    assert jnp.allclose(out, ref, atol=1e-4, rtol=1e-4), "mismatch vs JAX reference"
    print("KERNEL_OK")
</pallas_src>

<mosaic_0001>
module attributes {stable_mosaic.version = 11 : i64} {
  func.func @kernel(%arg0: memref<64x32xf32, #tpu.memory_space<vmem>>, %arg1: memref<32x128xf32, #tpu.memory_space<vmem>>, %arg2: memref<32x128xf32, #tpu.memory_space<vmem>>, %arg3: memref<1x128xf32, #tpu.memory_space<vmem>>, %arg4: memref<32x128xf32, #tpu.memory_space<vmem>>, %arg5: memref<1x128xf32, #tpu.memory_space<vmem>>, %arg6: memref<64x128xf32, #tpu.memory_space<vmem>>, %arg7: memref<64x32xf32, #tpu.memory_space<vmem>>) attributes {dimension_semantics = [], scalar_prefetch = 0 : i64, scratch_operands = 1 : i64, tpu.core_type = #tpu.core_type<tc>} {
    %c0 = arith.constant 0 : index
    %c0_0 = arith.constant 0 : index
    %0 = vector.load %arg0[%c0, %c0_0] : memref<64x32xf32, #tpu.memory_space<vmem>>, vector<64x32xf32>
    %c0_1 = arith.constant 0 : index
    %c0_2 = arith.constant 0 : index
    %1 = vector.load %arg1[%c0_1, %c0_2] : memref<32x128xf32, #tpu.memory_space<vmem>>, vector<32x128xf32>
    %cst = arith.constant dense<0.000000e+00> : vector<64x128xf32>
    %2 = tpu.matmul %0, %1, %cst {dimension_numbers = #tpu.dot_dimension_numbers<[1], [0], [0], [1], [0, 0, 1, 1], [], []>} : vector<64x32xf32>, vector<32x128xf32>, vector<64x128xf32> -> vector<64x128xf32>
    %c0_3 = arith.constant 0 : index
    %c0_4 = arith.constant 0 : index
    %3 = vector.load %arg3[%c0_3, %c0_4] : memref<1x128xf32, #tpu.memory_space<vmem>>, vector<1x128xf32>
    %4 = vector.broadcast %3 : vector<1x128xf32> to vector<64x128xf32>
    %5 = arith.addf %2, %4 : vector<64x128xf32>
    %c0_5 = arith.constant 0 : index
    %c0_6 = arith.constant 0 : index
    %6 = vector.load %arg2[%c0_5, %c0_6] : memref<32x128xf32, #tpu.memory_space<vmem>>, vector<32x128xf32>
    %7 = tpu.iota {dimensions = array<i32: 1>} : vector<8x128xi32>
    %c64_i32 = arith.constant 64 : i32
    %8 = vector.broadcast %c64_i32 : i32 to vector<8x128xi32>
    %9 = arith.cmpi sge, %7, %8 : vector<8x128xi32>
    %c96_i32 = arith.constant 96 : i32
    %10 = vector.broadcast %c96_i32 : i32 to vector<8x128xi32>
    %11 = arith.cmpi slt, %7, %10 : vector<8x128xi32>
    %12 = arith.andi %9, %11 : vector<8x128xi1>
    %cst_7 = arith.constant 0.000000e+00 : f32
    %13 = vector.broadcast %cst_7 : f32 to vector<8x32xf32>
    %cst_8 = arith.constant 0.000000e+00 : f32
    %14 = vector.broadcast %cst_8 : f32 to vector<8x32xf32>
    %15 = vector.extract_strided_slice %5 {offsets = [0, 0], sizes = [8, 128], strides = [1, 1]} : vector<64x128xf32> to vector<8x128xf32>
    %cst_9 = arith.constant dense<0.000000e+00> : vector<8x128xf32>
    %16 = tpu.matmul %13, %6, %cst_9 {dimension_numbers = #tpu.dot_dimension_numbers<[1], [0], [0], [1], [0, 0, 1, 1], [], []>} : vector<8x32xf32>, vector<32x128xf32>, vector<8x128xf32> -> vector<8x128xf32>
    %17 = arith.addf %15, %16 : vector<8x128xf32>
    %18 = math.tanh %17 : vector<8x128xf32>
    %19 = arith.negf %17 : vector<8x128xf32>
    %20 = math.exp %19 : vector<8x128xf32>
    %cst_10 = arith.constant 1.000000e+00 : f32
    %21 = vector.broadcast %cst_10 : f32 to vector<8x128xf32>
    %22 = arith.addf %21, %20 : vector<8x128xf32>
    %23 = arith.divf %21, %22 : vector<8x128xf32>
    %24 = arith.select %12, %18, %23 : vector<8x128xi1>, vector<8x128xf32>
    %25 = vector.extract_strided_slice %24 {offsets = [0, 0], sizes = [8, 32], strides = [1, 1]} : vector<8x128xf32> to vector<8x32xf32>
    %26 = vector.extract_strided_slice %24 {offsets = [0, 32], sizes = [8, 32], strides = [1, 1]} : vector<8x128xf32> to vector<8x32xf32>
    %27 = vector.extract_strided_slice %24 {offsets = [0, 64], sizes = [8, 32], strides = [1, 1]} : vector<8x128xf32> to vector<8x32xf32>
    %28 = vector.extract_strided_slice %24 {offsets = [0, 96], sizes = [8, 32], strides = [1, 1]} : vector<8x128xf32> to vector<8x32xf32>
    %29 = arith.mulf %26, %14 : vector<8x32xf32>
    %30 = arith.mulf %25, %27 : vector<8x32xf32>
    %31 = arith.addf %29, %30 : vector<8x32xf32>
    %32 = math.tanh %31 : vector<8x32xf32>
    %33 = arith.mulf %28, %32 : vector<8x32xf32>
    %c0_11 = arith.constant 0 : index
    %c0_12 = arith.constant 0 : index
    %34 = vector.load %arg7[%c0_11, %c0_12] : memref<64x32xf32, #tpu.memory_space<vmem>>, vector<8x32xf32>
    tpu.vector_store %arg7[%c0_11, %c0_12], %33 {strides = array<i32>} : memref<64x32xf32, #tpu.memory_space<vmem>>, vector<8x32xf32>,
    %35 = vector.extract_strided_slice %5 {offsets = [8, 0], sizes = [8, 128], strides = [1, 1]} : vector<64x128xf32> to vector<8x128xf32>
    %cst_13 = arith.constant dense<0.000000e+00> : vector<8x128xf32>
    %36 = tpu.matmul %33, %6, %cst_13 {dimension_numbers = #tpu.dot_dimension_numbers<[1], [0], [0], [1], [0, 0, 1, 1], [], []>} : vector<8x32xf32>, vector<32x128xf32>, vector<8x128xf32> -> vector<8x128xf32>
    %37 = arith.addf %35, %36 : vector<8x128xf32>
    %38 = math.tanh %37 : vector<8x128xf32>
    %39 = arith.negf %37 : vector<8x128xf32>
    %40 = math.exp %39 : vector<8x128xf32>
    %cst_14 = arith.constant 1.000000e+00 : f32
    %41 = vector.broadcast %cst_14 : f32 to vector<8x128xf32>
    %42 = arith.addf %41, %40 : vector<8x128xf32>
    %43 = arith.divf %41, %42 : vector<8x128xf32>
    %44 = arith.select %12, %38, %43 : vector<8x128xi1>, vector<8x128xf32>
    %45 = vector.extract_strided_slice %44 {offsets = [0, 0], sizes = [8, 32], strides = [1, 1]} : vector<8x128xf32> to vector<8x32xf32>
    %46 = vector.extract_strided_slice %44 {offsets = [0, 32], sizes = [8, 32], strides = [1, 1]} : vector<8x128xf32> to vector<8x32xf32>
    %47 = vector.extract_strided_slice %44 {offsets = [0, 64], sizes = [8, 32], strides = [1, 1]} : vector<8x128xf32> to vector<8x32xf32>
    %48 = vector.extract_strided_slice %44 {offsets = [0, 96], sizes = [8, 32], strides = [1, 1]} : vector<8x128xf32> to vector<8x32xf32>
    %49 = arith.mulf %46, %31 : vector<8x32xf32>
    %50 = arith.mulf %45, %47 : vector<8x32xf32>
    %51 = arith.addf %49, %50 : vector<8x32xf32>
    %52 = math.tanh %51 : vector<8x32xf32>
    %53 = arith.mulf %48, %52 : vector<8x32xf32>
    %c8 = arith.constant 8 : index
    %c0_15 = arith.constant 0 : index
    %54 = vector.load %arg7[%c8, %c0_15] : memref<64x32xf32, #tpu.memory_space<vmem>>, vector<8x32xf32>
    tpu.vector_store %arg7[%c8, %c0_15], %53 {strides = array<i32>} : memref<64x32xf32, #tpu.memory_space<vmem>>, vector<8x32xf32>,
    %55 = vector.extract_strided_slice %5 {offsets = [16, 0], sizes = [8, 128], strides = [1, 1]} : vector<64x128xf32> to vector<8x128xf32>
    %cst_16 = arith.constant dense<0.000000e+00> : vector<8x128xf32>
    %56 = tpu.matmul %53, %6, %cst_16 {dimension_numbers = #tpu.dot_dimension_numbers<[1], [0], [0], [1], [0, 0, 1, 1], [], []>} : vector<8x32xf32>, vector<32x128xf32>, vector<8x128xf32> -> vector<8x128xf32>
    %57 = arith.addf %55, %56 : vector<8x128xf32>
    %58 = math.tanh %57 : vector<8x128xf32>
    %59 = arith.negf %57 : vector<8x128xf32>
    %60 = math.exp %59 : vector<8x128xf32>
    %cst_17 = arith.constant 1.000000e+00 : f32
    %61 = vector.broadcast %cst_17 : f32 to vector<8x128xf32>
    %62 = arith.addf %61, %60 : vector<8x128xf32>
    %63 = arith.divf %61, %62 : vector<8x128xf32>
    %64 = arith.select %12, %58, %63 : vector<8x128xi1>, vector<8x128xf32>
    %65 = vector.extract_strided_slice %64 {offsets = [0, 0], sizes = [8, 32], strides = [1, 1]} : vector<8x128xf32> to vector<8x32xf32>
    %66 = vector.extract_strided_slice %64 {offsets = [0, 32], sizes = [8, 32], strides = [1, 1]} : vector<8x128xf32> to vector<8x32xf32>
    %67 = vector.extract_strided_slice %64 {offsets = [0, 64], sizes = [8, 32], strides = [1, 1]} : vector<8x128xf32> to vector<8x32xf32>
    %68 = vector.extract_strided_slice %64 {offsets = [0, 96], sizes = [8, 32], strides = [1, 1]} : vector<8x128xf32> to vector<8x32xf32>
    %69 = arith.mulf %66, %51 : vector<8x32xf32>
    %70 = arith.mulf %65, %67 : vector<8x32xf32>
    %71 = arith.addf %69, %70 : vector<8x32xf32>
    %72 = math.tanh %71 : vector<8x32xf32>
    %73 = arith.mulf %68, %72 : vector<8x32xf32>
    %c16 = arith.constant 16 : index
    %c0_18 = arith.constant 0 : index
    %74 = vector.load %arg7[%c16, %c0_18] : memref<64x32xf32, #tpu.memory_space<vmem>>, vector<8x32xf32>
    tpu.vector_store %arg7[%c16, %c0_18], %73 {strides = array<i32>} : memref<64x32xf32, #tpu.memory_space<vmem>>, vector<8x32xf32>,
    %75 = vector.extract_strided_slice %5 {offsets = [24, 0], sizes = [8, 128], strides = [1, 1]} : vector<64x128xf32> to vector<8x128xf32>
    %cst_19 = arith.constant dense<0.000000e+00> : vector<8x128xf32>
    %76 = tpu.matmul %73, %6, %cst_19 {dimension_numbers = #tpu.dot_dimension_numbers<[1], [0], [0], [1], [0, 0, 1, 1], [], []>} : vector<8x32xf32>, vector<32x128xf32>, vector<8x128xf32> -> vector<8x128xf32>
    %77 = arith.addf %75, %76 : vector<8x128xf32>
    %78 = math.tanh %77 : vector<8x128xf32>
    %79 = arith.negf %77 : vector<8x128xf32>
    %80 = math.exp %79 : vector<8x128xf32>
    %cst_20 = arith.constant 1.000000e+00 : f32
    %81 = vector.broadcast %cst_20 : f32 to vector<8x128xf32>
    %82 = arith.addf %81, %80 : vector<8x128xf32>
    %83 = arith.divf %81, %82 : vector<8x128xf32>
    %84 = arith.select %12, %78, %83 : vector<8x128xi1>, vector<8x128xf32>
    %85 = vector.extract_strided_slice %84 {offsets = [0, 0], sizes = [8, 32], strides = [1, 1]} : vector<8x128xf32> to vector<8x32xf32>
    %86 = vector.extract_strided_slice %84 {offsets = [0, 32], sizes = [8, 32], strides = [1, 1]} : vector<8x128xf32> to vector<8x32xf32>
    %87 = vector.extract_strided_slice %84 {offsets = [0, 64], sizes = [8, 32], strides = [1, 1]} : vector<8x128xf32> to vector<8x32xf32>
    %88 = vector.extract_strided_slice %84 {offsets = [0, 96], sizes = [8, 32], strides = [1, 1]} : vector<8x128xf32> to vector<8x32xf32>
    %89 = arith.mulf %86, %71 : vector<8x32xf32>
    %90 = arith.mulf %85, %87 : vector<8x32xf32>
    %91 = arith.addf %89, %90 : vector<8x32xf32>
    %92 = math.tanh %91 : vector<8x32xf32>
    %93 = arith.mulf %88, %92 : vector<8x32xf32>
    %c24 = arith.constant 24 : index
    %c0_21 = arith.constant 0 : index
    %94 = vector.load %arg7[%c24, %c0_21] : memref<64x32xf32, #tpu.memory_space<vmem>>, vector<8x32xf32>
    tpu.vector_store %arg7[%c24, %c0_21], %93 {strides = array<i32>} : memref<64x32xf32, #tpu.memory_space<vmem>>, vector<8x32xf32>,
    %95 = vector.extract_strided_slice %5 {offsets = [32, 0], sizes = [8, 128], strides = [1, 1]} : vector<64x128xf32> to vector<8x128xf32>
    %cst_22 = arith.constant dense<0.000000e+00> : vector<8x128xf32>
    %96 = tpu.matmul %93, %6, %cst_22 {dimension_numbers = #tpu.dot_dimension_numbers<[1], [0], [0], [1], [0, 0, 1, 1], [], []>} : vector<8x32xf32>, vector<32x128xf32>, vector<8x128xf32> -> vector<8x128xf32>
    %97 = arith.addf %95, %96 : vector<8x128xf32>
    %98 = math.tanh %97 : vector<8x128xf32>
    %99 = arith.negf %97 : vector<8x128xf32>
    %100 = math.exp %99 : vector<8x128xf32>
    %cst_23 = arith.constant 1.000000e+00 : f32
    %101 = vector.broadcast %cst_23 : f32 to vector<8x128xf32>
    %102 = arith.addf %101, %100 : vector<8x128xf32>
    %103 = arith.divf %101, %102 : vector<8x128xf32>
    %104 = arith.select %12, %98, %103 : vector<8x128xi1>, vector<8x128xf32>
    %105 = vector.extract_strided_slice %104 {offsets = [0, 0], sizes = [8, 32], strides = [1, 1]} : vector<8x128xf32> to vector<8x32xf32>
    %106 = vector.extract_strided_slice %104 {offsets = [0, 32], sizes = [8, 32], strides = [1, 1]} : vector<8x128xf32> to vector<8x32xf32>
    %107 = vector.extract_strided_slice %104 {offsets = [0, 64], sizes = [8, 32], strides = [1, 1]} : vector<8x128xf32> to vector<8x32xf32>
    %108 = vector.extract_strided_slice %104 {offsets = [0, 96], sizes = [8, 32], strides = [1, 1]} : vector<8x128xf32> to vector<8x32xf32>
    %109 = arith.mulf %106, %91 : vector<8x32xf32>
    %110 = arith.mulf %105, %107 : vector<8x32xf32>
    %111 = arith.addf %109, %110 : vector<8x32xf32>
    %112 = math.tanh %111 : vector<8x32xf32>
    %113 = arith.mulf %108, %112 : vector<8x32xf32>
    %c32 = arith.constant 32 : index
    %c0_24 = arith.constant 0 : index
    %114 = vector.load %arg7[%c32, %c0_24] : memref<64x32xf32, #tpu.memory_space<vmem>>, vector<8x32xf32>
    tpu.vector_store %arg7[%c32, %c0_24], %113 {strides = array<i32>} : memref<64x32xf32, #tpu.memory_space<vmem>>, vector<8x32xf32>,
    %115 = vector.extract_strided_slice %5 {offsets = [40, 0], sizes = [8, 128], strides = [1, 1]} : vector<64x128xf32> to vector<8x128xf32>
    %cst_25 = arith.constant dense<0.000000e+00> : vector<8x128xf32>
    %116 = tpu.matmul %113, %6, %cst_25 {dimension_numbers = #tpu.dot_dimension_numbers<[1], [0], [0], [1], [0, 0, 1, 1], [], []>} : vector<8x32xf32>, vector<32x128xf32>, vector<8x128xf32> -> vector<8x128xf32>
    %117 = arith.addf %115, %116 : vector<8x128xf32>
    %118 = math.tanh %117 : vector<8x128xf32>
    %119 = arith.negf %117 : vector<8x128xf32>
    %120 = math.exp %119 : vector<8x128xf32>
    %cst_26 = arith.constant 1.000000e+00 : f32
    %121 = vector.broadcast %cst_26 : f32 to vector<8x128xf32>
    %122 = arith.addf %121, %120 : vector<8x128xf32>
    %123 = arith.divf %121, %122 : vector<8x128xf32>
    %124 = arith.select %12, %118, %123 : vector<8x128xi1>, vector<8x128xf32>
    %125 = vector.extract_strided_slice %124 {offsets = [0, 0], sizes = [8, 32], strides = [1, 1]} : vector<8x128xf32> to vector<8x32xf32>
    %126 = vector.extract_strided_slice %124 {offsets = [0, 32], sizes = [8, 32], strides = [1, 1]} : vector<8x128xf32> to vector<8x32xf32>
    %127 = vector.extract_strided_slice %124 {offsets = [0, 64], sizes = [8, 32], strides = [1, 1]} : vector<8x128xf32> to vector<8x32xf32>
    %128 = vector.extract_strided_slice %124 {offsets = [0, 96], sizes = [8, 32], strides = [1, 1]} : vector<8x128xf32> to vector<8x32xf32>
    %129 = arith.mulf %126, %111 : vector<8x32xf32>
    %130 = arith.mulf %125, %127 : vector<8x32xf32>
    %131 = arith.addf %129, %130 : vector<8x32xf32>
    %132 = math.tanh %131 : vector<8x32xf32>
    %133 = arith.mulf %128, %132 : vector<8x32xf32>
    %c40 = arith.constant 40 : index
    %c0_27 = arith.constant 0 : index
    %134 = vector.load %arg7[%c40, %c0_27] : memref<64x32xf32, #tpu.memory_space<vmem>>, vector<8x32xf32>
    tpu.vector_store %arg7[%c40, %c0_27], %133 {strides = array<i32>} : memref<64x32xf32, #tpu.memory_space<vmem>>, vector<8x32xf32>,
    %135 = vector.extract_strided_slice %5 {offsets = [48, 0], sizes = [8, 128], strides = [1, 1]} : vector<64x128xf32> to vector<8x128xf32>
    %cst_28 = arith.constant dense<0.000000e+00> : vector<8x128xf32>
    %136 = tpu.matmul %133, %6, %cst_28 {dimension_numbers = #tpu.dot_dimension_numbers<[1], [0], [0], [1], [0, 0, 1, 1], [], []>} : vector<8x32xf32>, vector<32x128xf32>, vector<8x128xf32> -> vector<8x128xf32>
    %137 = arith.addf %135, %136 : vector<8x128xf32>
    %138 = math.tanh %137 : vector<8x128xf32>
    %139 = arith.negf %137 : vector<8x128xf32>
    %140 = math.exp %139 : vector<8x128xf32>
    %cst_29 = arith.constant 1.000000e+00 : f32
    %141 = vector.broadcast %cst_29 : f32 to vector<8x128xf32>
    %142 = arith.addf %141, %140 : vector<8x128xf32>
    %143 = arith.divf %141, %142 : vector<8x128xf32>
    %144 = arith.select %12, %138, %143 : vector<8x128xi1>, vector<8x128xf32>
    %145 = vector.extract_strided_slice %144 {offsets = [0, 0], sizes = [8, 32], strides = [1, 1]} : vector<8x128xf32> to vector<8x32xf32>
    %146 = vector.extract_strided_slice %144 {offsets = [0, 32], sizes = [8, 32], strides = [1, 1]} : vector<8x128xf32> to vector<8x32xf32>
    %147 = vector.extract_strided_slice %144 {offsets = [0, 64], sizes = [8, 32], strides = [1, 1]} : vector<8x128xf32> to vector<8x32xf32>
    %148 = vector.extract_strided_slice %144 {offsets = [0, 96], sizes = [8, 32], strides = [1, 1]} : vector<8x128xf32> to vector<8x32xf32>
    %149 = arith.mulf %146, %131 : vector<8x32xf32>
    %150 = arith.mulf %145, %147 : vector<8x32xf32>
    %151 = arith.addf %149, %150 : vector<8x32xf32>
    %152 = math.tanh %151 : vector<8x32xf32>
    %153 = arith.mulf %148, %152 : vector<8x32xf32>
    %c48 = arith.constant 48 : index
    %c0_30 = arith.constant 0 : index
    %154 = vector.load %arg7[%c48, %c0_30] : memref<64x32xf32, #tpu.memory_space<vmem>>, vector<8x32xf32>
    tpu.vector_store %arg7[%c48, %c0_30], %153 {strides = array<i32>} : memref<64x32xf32, #tpu.memory_space<vmem>>, vector<8x32xf32>,
    %155 = vector.extract_strided_slice %5 {offsets = [56, 0], sizes = [8, 128], strides = [1, 1]} : vector<64x128xf32> to vector<8x128xf32>
    %cst_31 = arith.constant dense<0.000000e+00> : vector<8x128xf32>
    %156 = tpu.matmul %153, %6, %cst_31 {dimension_numbers = #tpu.dot_dimension_numbers<[1], [0], [0], [1], [0, 0, 1, 1], [], []>} : vector<8x32xf32>, vector<32x128xf32>, vector<8x128xf32> -> vector<8x128xf32>
    %157 = arith.addf %155, %156 : vector<8x128xf32>
    %158 = math.tanh %157 : vector<8x128xf32>
    %159 = arith.negf %157 : vector<8x128xf32>
    %160 = math.exp %159 : vector<8x128xf32>
    %cst_32 = arith.constant 1.000000e+00 : f32
    %161 = vector.broadcast %cst_32 : f32 to vector<8x128xf32>
    %162 = arith.addf %161, %160 : vector<8x128xf32>
    %163 = arith.divf %161, %162 : vector<8x128xf32>
    %164 = arith.select %12, %158, %163 : vector<8x128xi1>, vector<8x128xf32>
    %165 = vector.extract_strided_slice %164 {offsets = [0, 0], sizes = [8, 32], strides = [1, 1]} : vector<8x128xf32> to vector<8x32xf32>
    %166 = vector.extract_strided_slice %164 {offsets = [0, 32], sizes = [8, 32], strides = [1, 1]} : vector<8x128xf32> to vector<8x32xf32>
    %167 = vector.extract_strided_slice %164 {offsets = [0, 64], sizes = [8, 32], strides = [1, 1]} : vector<8x128xf32> to vector<8x32xf32>
    %168 = vector.extract_strided_slice %164 {offsets = [0, 96], sizes = [8, 32], strides = [1, 1]} : vector<8x128xf32> to vector<8x32xf32>
    %169 = arith.mulf %166, %151 : vector<8x32xf32>
    %170 = arith.mulf %165, %167 : vector<8x32xf32>
    %171 = arith.addf %169, %170 : vector<8x32xf32>
    %172 = math.tanh %171 : vector<8x32xf32>
    %173 = arith.mulf %168, %172 : vector<8x32xf32>
    %c56 = arith.constant 56 : index
    %c0_33 = arith.constant 0 : index
    %174 = vector.load %arg7[%c56, %c0_33] : memref<64x32xf32, #tpu.memory_space<vmem>>, vector<8x32xf32>
    tpu.vector_store %arg7[%c56, %c0_33], %173 {strides = array<i32>} : memref<64x32xf32, #tpu.memory_space<vmem>>, vector<8x32xf32>,
    %c0_34 = arith.constant 0 : index
    %c0_35 = arith.constant 0 : index
    %175 = vector.load %arg7[%c0_34, %c0_35] : memref<64x32xf32, #tpu.memory_space<vmem>>, vector<64x32xf32>
    %c0_36 = arith.constant 0 : index
    %c0_37 = arith.constant 0 : index
    %176 = vector.load %arg4[%c0_36, %c0_37] : memref<32x128xf32, #tpu.memory_space<vmem>>, vector<32x128xf32>
    %cst_38 = arith.constant dense<0.000000e+00> : vector<64x128xf32>
    %177 = tpu.matmul %175, %176, %cst_38 {dimension_numbers = #tpu.dot_dimension_numbers<[1], [0], [0], [1], [0, 0, 1, 1], [], []>} : vector<64x32xf32>, vector<32x128xf32>, vector<64x128xf32> -> vector<64x128xf32>
    %c0_39 = arith.constant 0 : index
    %c0_40 = arith.constant 0 : index
    %178 = vector.load %arg5[%c0_39, %c0_40] : memref<1x128xf32, #tpu.memory_space<vmem>>, vector<1x128xf32>
    %179 = vector.broadcast %178 : vector<1x128xf32> to vector<64x128xf32>
    %180 = arith.addf %177, %179 : vector<64x128xf32>
    %c0_41 = arith.constant 0 : index
    %c0_42 = arith.constant 0 : index
    %181 = vector.load %arg6[%c0_41, %c0_42] : memref<64x128xf32, #tpu.memory_space<vmem>>, vector<64x128xf32>
    tpu.vector_store %arg6[%c0_41, %c0_42], %180 {strides = array<i32>} : memref<64x128xf32, #tpu.memory_space<vmem>>, vector<64x128xf32>,
    return
  }
}

</mosaic_0001>

<bundles_post_ra>
// kernel: lstm_forward.1
= control target key start
LH: loop header
LB: loop body
LE: loop exit
PB: predicated region body
PF: predicated region fallthrough
CT: control target
= control target key end

     0   :  { %vm42_vm0 = vcmask 261120   ;;  %v1467_v8 = vmov 0.0   ;;  %vm1468_vm1 = vmmov 0   ;;  %v176_v29 = vlaneseq  ;;  %s1470_s25 = smov 32   ;;  %s1804_s1 = inlined_call_operand.vmem [shape: f32[32,128], index: 1, kind: input, shape index: {}]   ;;  %s1805_s0 = inlined_call_operand.vmem [shape: f32[64,32], index: 0, kind: input, shape index: {}]   ;;  %s1806_s2 = inlined_call_operand.vmem [shape: f32[32,128], index: 2, kind: input, shape index: {}]   ;;  %s1807_s3 = inlined_call_operand.vmem [shape: f32[1,128], index: 3, kind: input, shape index: {}]   ;;  %s1808_s4 = inlined_call_operand.vmem [shape: f32[32,128], index: 4, kind: input, shape index: {}]   ;;  %s1809_s5 = inlined_call_operand.vmem [shape: f32[1,128], index: 5, kind: input, shape index: {}]   ;;  %s1810_s6 = inlined_call_operand.vmem [shape: f32[64,128], index: 6, kind: output, shape index: {}]  }
   0x1   :  { %v34_v0 = vld [vmem:[%s1804_s1 + $0x18] sm:$0xff]  ;;  %v33_v1 = vld [vmem:[%s1804_s1 + $0x10] sm:$0xff]  ;;  %v32_v2 = vld [vmem:[%s1804_s1 + $0x8] sm:$0xff] }
   0x2   :  { %1391 = vmatprep.subr.mxu1 %v34_v0  ;;  %1263 = vmatprep.subr.mxu0 %v34_v0  ;;  %v27_v3 = vld [vmem:[%s1805_s0 + $0x20] sm:$0xff]  ;;  %v28_v5 = vld [vmem:[%s1805_s0 + $0x28] sm:$0xff]  ;;  %v1528_v6 = vld [vmem:[%s1806_s2 + $0x18] sm:$0xff]  ;;  %v177_v30 = vand.u32 127, %v176_v29 }
   0x3   :  { %1395 = vmatpush3.msra.mxu1 %v34_v0  ;;  %1264 = vmatpush3.msra.mxu0 %v34_v0  ;;  %v31_v4 = vld [vmem:[%s1804_s1] sm:$0xff]  ;;  %v24_v9 = vld [vmem:[%s1805_s0 + $0x8] sm:$0xff]  ;;  %v29_v10 = vld [vmem:[%s1805_s0 + $0x30] sm:$0xff] }
   0x4   :  { %1392 = vmatprep.subr.mxu1 %v33_v1  ;;  %1265 = vmatprep.subr.mxu0 %v33_v1  ;;  %v23_v7 = vld [vmem:[%s1805_s0] sm:$0xff]  ;;  %v1545_v11 = vld [vmem:[%s1806_s2 + $0x10] sm:$0xff]  ;;  %v30_v12 = vld [vmem:[%s1805_s0 + $0x38] sm:$0xff]  ;;  %vm178_vm2 = vcmp.ge.s32.totalorder %v177_v30, 64  ;;  %vm179_vm3 = vcmp.lt.s32.totalorder %v177_v30, 96 }
   0x5   :  { %1396 = vmatpush3.msra.mxu1 %v33_v1  ;;  %1266 = vmatpush3.msra.mxu0 %v33_v1  ;;  %v1557_v13 = vld [vmem:[%s1806_s2 + $0x8] sm:$0xff]  ;;  %v1566_v14 = vld [vmem:[%s1806_s2] sm:$0xff]  ;;  %vm1607_vm4 = vmand %vm178_vm2, %vm179_vm3 }
   0x6   :  { %1393 = vmatprep.subr.mxu1 %v32_v2  ;;  %1267 = vmatprep.subr.mxu0 %v32_v2  ;;  %v1602_v20 = vld [vmem:[%s1807_s3] ss:$0 sm:$0xff]  ;;  %s1469_s3 = smov 64   ;;  %v25_v59 = vld [vmem:[%s1805_s0 + $0x10] sm:$0xff]  ;;  %v26_v60 = vld [vmem:[%s1805_s0 + $0x18] sm:$0xff] }
   0x7   :  { %1397 = vmatpush3.msra.mxu1 %v32_v2  ;;  %1277 = vmatprep.mubr.msk.f32.mxu1 %vm42_vm0, %v27_v3 }
   0x8   :  { %1394 = vmatprep.subr.mxu1 %v31_v4  ;;  %1268 = vmatpush3.msra.mxu0 %v32_v2 }
   0x9   :  { %1398 = vmatpush3.msra.mxu1 %v31_v4  ;;  %1269 = vmatprep.subr.mxu0 %v31_v4 }
   0xa   :  { %1278 = vmatmul.mubr.msk.f32.vlgmr.msra.gmra.mxu1 %vm42_vm0, %v28_v5  ;;  %1283 = vmatprep.subr.mxu1 %v1467_v8 }
   0xb   :  { %1284 = vmatpush3.msra.mxu1 %v1528_v6  ;;  %1270 = vmatpush3.msra.mxu0 %v31_v4 }
   0xc   :  { %1271 = vmatprep.mubr.msk.f32.mxu0 %vm42_vm0, %v23_v7  ;;  %1285 = vmatprep.subr.mxu1 %v1467_v8 }
   0xd   :  { %1272 = vmatmul.mubr.msk.f32.vlgmr.msra.gmra.mxu0 %vm42_vm0, %v24_v9  ;;  %1280 = vmatprep.mubr.msk.f32.mxu1 %vm42_vm0, %v29_v10 }
   0xe   :  { %1286 = vmatpush3.msra.mxu1 %v1545_v11  ;;  %1305 = vmatprep.subr.mxu0 %v1467_v8 }
   0xf   :  { %1281 = vmatmul.mubr.msk.f32.gmra.mxu1 %vm42_vm0, %v30_v12  ;;  %1287 = vmatprep.subr.mxu1 %v1467_v8 }
  0x10   :  { %1288 = vmatpush3.msra.mxu1 %v1557_v13  ;;  %1291 = vmatprep.mubr.msk.f32.mxu1 %vm1468_vm1, %v1467_v8 }
  0x11   :  { %1289 = vmatprep.subr.mxu1 %v1467_v8  ;;  %1306 = vmatpush3.msra.mxu0 %v1528_v6 }
  0x12   :  { %1290 = vmatpush3.msra.mxu1 %v1566_v14  ;;  %1307 = vmatprep.subr.mxu0 %v1467_v8 }
  0x13   :  { %1292 = vmatmul.mubr.f32.vlgmr.msra.gmra.mxu1 %v1467_v8  ;;  %1294 = vmatprep.subr.mxu1 %v1467_v8 }
  0x14   :  { %1295 = vmatpush3.msra.mxu1 %v1528_v6  ;;  %1302 = vmatprep.mubr.msk.f32.mxu1 %vm1468_vm1, %v1467_v8 }
  0x15   :  { %1296 = vmatprep.subr.mxu1 %v1467_v8  ;;  %1308 = vmatpush3.msra.mxu0 %v1545_v11 }
  0x16   :  { %1297 = vmatpush3.msra.mxu1 %v1545_v11  ;;  %1309 = vmatprep.subr.mxu0 %v1467_v8 }
  0x17   :  { %1298 = vmatprep.subr.mxu1 %v1467_v8  ;;  %1310 = vmatpush3.msra.mxu0 %v1557_v13 }
  0x18   :  { %1299 = vmatpush3.msra.mxu1 %v1557_v13  ;;  %1311 = vmatprep.subr.mxu0 %v1467_v8 }
  0x19   :  { %1300 = vmatprep.subr.mxu1 %v1467_v8  ;;  %1312 = vmatpush3.msra.mxu0 %v1566_v14 }
  0x1a   :  { %1301 = vmatpush3.msra.mxu1 %v1566_v14  ;;  %1327 = vmatprep.subr.mxu0 %v1467_v8 }
  0x1b   :  { %1316 = vmatprep.subr.mxu1 %v1467_v8  ;;  %1274 = vmatprep.mubr.msk.f32.mxu0 %vm42_vm0, %v25_v59 }
  0x1c   :  { %1275 = vmatmul.mubr.msk.f32.gmra.mxu0 %vm42_vm0, %v26_v60 }
  0x1d   :  { %1313 = vmatprep.mubr.msk.f32.mxu0 %vm1468_vm1, %v1467_v8 }
  0xca   :  { %v1593_v15 = vpop.f32.mrf.mxu1 }
  0xcc   :  { %v1595_v16 = vpop.f32.mrf.mxu1 }
  0xcd   :  { %v1273_v17 = vpop.f32.mrf.mxu0 }
  0xce   :  { %v139_v44 = vadd.f32 %v1273_v17, %v1602_v20 }
  0xcf   :  { %v1597_v18 = vpop.f32.mrf.mxu1  ;;  %v133_v19 = vpop.f32.mrf.mxu0 }
  0xd0   :  { %v134_v22 = vadd.f32 %v1602_v20, %v133_v19 }
  0xd1   :  { %v1604_v21 = vpop.f32.mrf.mxu1 }
  0xd3   :  { %v250_v23 = vpop.f32.mrf.mxu1 }
  0xd4   :  { %v254_v24 = vadd.f32 %v250_v23, %v134_v22 }
  0xd5   :  { %v1293_v25 = vpop.f32.mrf.mxu1 }
  0xd6   :  { %v1175_v26 = vmul.f32 -1.442695, %v254_v24 }
  0xd8   :  { %1403 = vpow2.f32 %v1175_v26 }
  0xd9   :  { %1405 = vtanh.f32 %v254_v24 }
  0xdc   :  { %v1276_v1 = vpop.f32.mrf.mxu0 }
  0xde   :  { %v143_v2 = vpop.f32.mrf.mxu0 }
  0xdf   :  { %v144_v3 = vadd.f32 %v1602_v20, %v143_v2 }
  0xe5   :  { %v1404_v27 = vpop.eup %1403 }
  0xe6   :  { %v259_v28 = vadd.f32 1.0, %v1404_v27  ;;  %v1406_v32 = vpop.eup %1405 }
  0xe8   :  { %1407 = vrcp.f32 %v259_v28 }
  0xf5   :  { %v1408_v33 = vpop.eup %1407 }
  0xf6   :  { %v262_v34 = vsel %vm1607_vm4, %v1406_v32, %v1408_v33  ;;  %v149_v33 = vadd.f32 %v1276_v1, %v1602_v20 }
  0xf7   :  { %265 = vrot.lane.b32.xlu0 %v262_v34, %s1469_s3  ;;  %v263_v37 = vmul.f32 0.0, %v262_v34 }
 0x169   :  { %v266_v35 = vpop.permute.xlu0 %265 }
 0x16a   :  { %v268_v36 = vmul.f32 %v266_v35, %v262_v34 }
 0x16c   :  { %270 = vrot.lane.b32.xlu0 %v268_v36, %s1470_s25 }
 0x1de   :  { %v271_v38 = vpop.permute.xlu0 %270 }
 0x1df   :  { %v273_v39 = vadd.f32 %v271_v38, %v263_v37 }
 0x1e1   :  { %1409 = vtanh.f32 %v273_v39 }
 0x1ee   :  { %v1410_v40 = vpop.eup %1409 }
 0x1ef   :  { %276 = vrot.lane.b32.xlu1 %v1410_v40, %s1469_s3 }
 0x261   :  { %v277_v41 = vpop.permute.xlu1 %276 }
 0x262   :  { %v279_v42 = vmul.f32 %v277_v41, %v262_v34 }
 0x264   :  { %281 = vrot.lane.b32.xlu1 %v279_v42, %s1470_s25 }
 0x2d6   :  { %v282_v43 = vpop.permute.xlu1 %281 }
 0x2d7   :  { %284 = vst.msk [vmem:[#allocation2] sm:$0xff] %vm42_vm0, %v282_v43  ;;  %1303 = vmatmul.mubr.msk.f32.vlgmr.msra.gmra.mxu1 %vm42_vm0, %v282_v43 }
 0x2d8   :  { %1317 = vmatpush3.msra.mxu1 %v1528_v6  ;;  %1324 = vmatprep.mubr.msk.f32.mxu1 %vm1468_vm1, %v1467_v8 }
 0x2d9   :  { %1318 = vmatprep.subr.mxu1 %v1467_v8 }
 0x2da   :  { %1319 = vmatpush3.msra.mxu1 %v1545_v11 }
 0x2db   :  { %1320 = vmatprep.subr.mxu1 %v1467_v8 }
 0x2dc   :  { %1321 = vmatpush3.msra.mxu1 %v1557_v13 }
 0x2dd   :  { %1322 = vmatprep.subr.mxu1 %v1467_v8 }
 0x2de   :  { %1323 = vmatpush3.msra.mxu1 %v1566_v14 }
 0x2df   :  { %1338 = vmatprep.subr.mxu1 %v1467_v8 }
 0x397   :  { %v353_v45 = vpop.f32.mrf.mxu1 }
 0x398   :  { %v357_v46 = vadd.f32 %v353_v45, %v139_v44 }
 0x399   :  { %v1304_v47 = vpop.f32.mrf.mxu1 }
 0x39a   :  { %v1177_v48 = vmul.f32 -1.442695, %v357_v46 }
 0x39c   :  { %1411 = vpow2.f32 %v1177_v48 }
 0x39d   :  { %1413 = vtanh.f32 %v357_v46 }
 0x3a9   :  { %v1412_v49 = vpop.eup %1411 }
 0x3aa   :  { %v362_v50 = vadd.f32 1.0, %v1412_v49  ;;  %v1414_v51 = vpop.eup %1413 }
 0x3ac   :  { %1415 = vrcp.f32 %v362_v50 }
 0x3b9   :  { %v1416_v52 = vpop.eup %1415 }
 0x3ba   :  { %v365_v53 = vsel %vm1607_vm4, %v1414_v51, %v1416_v52  ;;  %v154_v52 = vadd.f32 %v1602_v20, %v1595_v16 }
 0x3bb   :  { %368 = vrot.lane.b32.xlu0 %v365_v53, %s1469_s3  ;;  %v366_v56 = vmul.f32 %v365_v53, %v273_v39 }
 0x42d   :  { %v369_v54 = vpop.permute.xlu0 %368 }
 0x42e   :  { %v371_v55 = vmul.f32 %v369_v54, %v365_v53 }
 0x430   :  { %373 = vrot.lane.b32.xlu1 %v371_v55, %s1470_s25 }
 0x4a2   :  { %v374_v57 = vpop.permute.xlu1 %373 }
 0x4a3   :  { %v376_v58 = vadd.f32 %v374_v57, %v366_v56 }
 0x4a5   :  { %1417 = vtanh.f32 %v376_v58 }
 0x4b2   :  { %v1418_v61 = vpop.eup %1417 }
 0x4b3   :  { %379 = vrot.lane.b32.xlu0 %v1418_v61, %s1469_s3 }
 0x525   :  { %v380_v62 = vpop.permute.xlu0 %379 }
 0x526   :  { %v382_v63 = vmul.f32 %v380_v62, %v365_v53 }
 0x528   :  { %384 = vrot.lane.b32.xlu1 %v382_v63, %s1470_s25 }
 0x59a   :  { %v385_v0 = vpop.permute.xlu1 %384 }
 0x59b   :  { %387 = vst.msk [vmem:[#allocation2 + $0x8] sm:$0xff] %vm42_vm0, %v385_v0  ;;  %1314 = vmatmul.mubr.msk.f32.vlgmr.msra.gmra.mxu0 %vm42_vm0, %v385_v0 }
 0x59c   :  { %1328 = vmatpush3.msra.mxu0 %v1528_v6  ;;  %1335 = vmatprep.mubr.msk.f32.mxu0 %vm1468_vm1, %v1467_v8 }
 0x59d   :  { %1329 = vmatprep.subr.mxu0 %v1467_v8 }
 0x59e   :  { %1330 = vmatpush3.msra.mxu0 %v1545_v11 }
 0x59f   :  { %1331 = vmatprep.subr.mxu0 %v1467_v8 }
 0x5a0   :  { %1332 = vmatpush3.msra.mxu0 %v1557_v13 }
 0x5a1   :  { %1333 = vmatprep.subr.mxu0 %v1467_v8 }
 0x5a2   :  { %1334 = vmatpush3.msra.mxu0 %v1566_v14 }
 0x5a3   :  { %1349 = vmatprep.subr.mxu0 %v1467_v8 }
 0x65b   :  { %v456_v4 = vpop.f32.mrf.mxu0 }
 0x65c   :  { %v460_v5 = vadd.f32 %v456_v4, %v144_v3 }
 0x65d   :  { %v1315_v7 = vpop.f32.mrf.mxu0 }
 0x65e   :  { %v1179_v9 = vmul.f32 -1.442695, %v460_v5  ;;  %v159_v7 = vadd.f32 %v1593_v15, %v1602_v20 }
 0x660   :  { %1419 = vpow2.f32 %v1179_v9 }
 0x661   :  { %1421 = vtanh.f32 %v460_v5 }
 0x66d   :  { %v1420_v10 = vpop.eup %1419 }
 0x66e   :  { %v465_v12 = vadd.f32 1.0, %v1420_v10  ;;  %v1422_v17 = vpop.eup %1421 }
 0x670   :  { %1423 = vrcp.f32 %v465_v12 }
 0x67d   :  { %v1424_v19 = vpop.eup %1423 }
 0x67e   :  { %v468_v22 = vsel %vm1607_vm4, %v1422_v17, %v1424_v19 }
 0x67f   :  { %471 = vrot.lane.b32.xlu0 %v468_v22, %s1469_s3  ;;  %v469_v25 = vmul.f32 %v468_v22, %v376_v58 }
 0x6f1   :  { %v472_v23 = vpop.permute.xlu0 %471 }
 0x6f2   :  { %v474_v24 = vmul.f32 %v472_v23, %v468_v22 }
 0x6f4   :  { %476 = vrot.lane.b32.xlu1 %v474_v24, %s1470_s25 }
 0x766   :  { %v477_v26 = vpop.permute.xlu1 %476 }
 0x767   :  { %v479_v27 = vadd.f32 %v477_v26, %v469_v25  ;;  %v1017_v25 = vld [vmem:[%s1808_s4 + $0x18] sm:$0xff] }
 0x769   :  { %1425 = vtanh.f32 %v479_v27 }
 0x776   :  { %v1426_v28 = vpop.eup %1425 }
 0x777   :  { %482 = vrot.lane.b32.xlu0 %v1426_v28, %s1469_s3 }
 0x7e9   :  { %v483_v29 = vpop.permute.xlu0 %482 }
 0x7ea   :  { %v485_v30 = vmul.f32 %v483_v29, %v468_v22 }
 0x7ec   :  { %487 = vrot.lane.b32.xlu1 %v485_v30, %s1470_s25  ;;  %v1016_v30 = vld [vmem:[%s1808_s4 + $0x10] sm:$0xff] }
 0x85e   :  { %v488_v32 = vpop.permute.xlu1 %487 }
 0x85f   :  { %490 = vst.msk [vmem:[#allocation2 + $0x10] sm:$0xff] %vm42_vm0, %v488_v32  ;;  %1325 = vmatmul.mubr.msk.f32.vlgmr.msra.gmra.mxu1 %vm42_vm0, %v488_v32  ;;  %v1006_v32 = vld [vmem:[#allocation2] sm:$0xff] }
 0x860   :  { %1339 = vmatpush3.msra.mxu1 %v1528_v6  ;;  %1346 = vmatprep.mubr.msk.f32.mxu1 %vm1468_vm1, %v1467_v8 }
 0x861   :  { %1340 = vmatprep.subr.mxu1 %v1467_v8 }
 0x862   :  { %1341 = vmatpush3.msra.mxu1 %v1545_v11 }
 0x863   :  { %1342 = vmatprep.subr.mxu1 %v1467_v8 }
 0x864   :  { %1343 = vmatpush3.msra.mxu1 %v1557_v13 }
 0x865   :  { %1344 = vmatprep.subr.mxu1 %v1467_v8 }
 0x866   :  { %1345 = vmatpush3.msra.mxu1 %v1566_v14 }
 0x867   :  { %1360 = vmatprep.subr.mxu1 %v1467_v8 }
 0x91f   :  { %v559_v34 = vpop.f32.mrf.mxu1 }
 0x920   :  { %v563_v35 = vadd.f32 %v559_v34, %v149_v33  ;;  %v1015_v33 = vld [vmem:[%s1808_s4 + $0x8] sm:$0xff]  ;;  %v1014_v34 = vld [vmem:[%s1808_s4] sm:$0xff] }
 0x921   :  { %v1326_v36 = vpop.f32.mrf.mxu1 }
 0x922   :  { %v1181_v37 = vmul.f32 -1.442695, %v563_v35  ;;  %v1008_v36 = vld [vmem:[#allocation2 + $0x10] sm:$0xff] }
 0x924   :  { %1427 = vpow2.f32 %v1181_v37 }
 0x925   :  { %1429 = vtanh.f32 %v563_v35  ;;  %v1007_v35 = vld [vmem:[#allocation2 + $0x8] sm:$0xff] }
 0x931   :  { %v1428_v38 = vpop.eup %1427 }
 0x932   :  { %v568_v39 = vadd.f32 1.0, %v1428_v38  ;;  %v1430_v40 = vpop.eup %1429 }
 0x934   :  { %1431 = vrcp.f32 %v568_v39 }
 0x941   :  { %v1432_v41 = vpop.eup %1431 }
 0x942   :  { %v571_v42 = vsel %vm1607_vm4, %v1430_v40, %v1432_v41  ;;  %v164_v40 = vadd.f32 %v1602_v20, %v1604_v21 }
 0x943   :  { %574 = vrot.lane.b32.xlu0 %v571_v42, %s1469_s3  ;;  %v572_v45 = vmul.f32 %v571_v42, %v479_v27 }
 0x9b5   :  { %v575_v43 = vpop.permute.xlu0 %574 }
 0x9b6   :  { %v577_v44 = vmul.f32 %v575_v43, %v571_v42 }
 0x9b8   :  { %579 = vrot.lane.b32.xlu1 %v577_v44, %s1470_s25 }
 0xa2a   :  { %v580_v46 = vpop.permute.xlu1 %579 }
 0xa2b   :  { %v582_v47 = vadd.f32 %v580_v46, %v572_v45  ;;  %v1750_v45 = vld [vmem:[%s1809_s5] ss:$0 sm:$0xff] }
 0xa2d   :  { %1433 = vtanh.f32 %v582_v47 }
 0xa3a   :  { %v1434_v48 = vpop.eup %1433 }
 0xa3b   :  { %585 = vrot.lane.b32.xlu0 %v1434_v48, %s1469_s3 }
 0xaad   :  { %v586_v49 = vpop.permute.xlu0 %585 }
 0xaae   :  { %v588_v50 = vmul.f32 %v586_v49, %v571_v42 }
 0xab0   :  { %590 = vrot.lane.b32.xlu1 %v588_v50, %s1470_s25 }
 0xb22   :  { %v591_v51 = vpop.permute.xlu1 %590 }
 0xb23   :  { %593 = vst.msk [vmem:[#allocation2 + $0x18] sm:$0xff] %vm42_vm0, %v591_v51  ;;  %1336 = vmatmul.mubr.msk.f32.vlgmr.msra.gmra.mxu0 %vm42_vm0, %v591_v51 }
 0xb24   :  { %1350 = vmatpush3.msra.mxu0 %v1528_v6  ;;  %1357 = vmatprep.mubr.msk.f32.mxu0 %vm1468_vm1, %v1467_v8 }
 0xb25   :  { %1351 = vmatprep.subr.mxu0 %v1467_v8 }
 0xb26   :  { %1352 = vmatpush3.msra.mxu0 %v1545_v11 }
 0xb27   :  { %1353 = vmatprep.subr.mxu0 %v1467_v8 }
 0xb28   :  { %1354 = vmatpush3.msra.mxu0 %v1557_v13 }
 0xb29   :  { %1355 = vmatprep.subr.mxu0 %v1467_v8 }
 0xb2a   :  { %1356 = vmatpush3.msra.mxu0 %v1566_v14  ;;  %v1009_v37 = vld [vmem:[#allocation2 + $0x18] sm:$0xff] }
 0xb2b   :  { %1371 = vmatprep.subr.mxu0 %v1017_v25 }
 0xbe3   :  { %v662_v53 = vpop.f32.mrf.mxu0 }
 0xbe4   :  { %v666_v54 = vadd.f32 %v662_v53, %v154_v52 }
 0xbe5   :  { %v1337_v55 = vpop.f32.mrf.mxu0 }
 0xbe6   :  { %v1183_v56 = vmul.f32 -1.442695, %v666_v54 }
 0xbe8   :  { %1435 = vpow2.f32 %v1183_v56 }
 0xbe9   :  { %1437 = vtanh.f32 %v666_v54 }
 0xbf5   :  { %v1436_v57 = vpop.eup %1435 }
 0xbf6   :  { %v671_v58 = vadd.f32 1.0, %v1436_v57  ;;  %v1438_v59 = vpop.eup %1437 }
 0xbf8   :  { %1439 = vrcp.f32 %v671_v58 }
 0xc05   :  { %v1440_v60 = vpop.eup %1439 }
 0xc06   :  { %v674_v61 = vsel %vm1607_vm4, %v1438_v59, %v1440_v60 }
 0xc07   :  { %677 = vrot.lane.b32.xlu0 %v674_v61, %s1469_s3  ;;  %v675_v16 = vmul.f32 %v674_v61, %v582_v47 }
 0xc79   :  { %v678_v62 = vpop.permute.xlu0 %677 }
 0xc7a   :  { %v680_v63 = vmul.f32 %v678_v62, %v674_v61 }
 0xc7c   :  { %682 = vrot.lane.b32.xlu1 %v680_v63, %s1470_s25 }
 0xcee   :  { %v683_v0 = vpop.permute.xlu1 %682 }
 0xcef   :  { %v685_v1 = vadd.f32 %v683_v0, %v675_v16 }
 0xcf1   :  { %1441 = vtanh.f32 %v685_v1 }
 0xcfe   :  { %v1442_v2 = vpop.eup %1441 }
 0xcff   :  { %688 = vrot.lane.b32.xlu0 %v1442_v2, %s1469_s3 }
 0xd71   :  { %v689_v3 = vpop.permute.xlu0 %688 }
 0xd72   :  { %v691_v4 = vmul.f32 %v689_v3, %v674_v61 }
 0xd74   :  { %693 = vrot.lane.b32.xlu1 %v691_v4, %s1470_s25 }
 0xde6   :  { %v694_v5 = vpop.permute.xlu1 %693 }
 0xde7   :  { %696 = vst.msk [vmem:[#allocation2 + $0x20] sm:$0xff] %vm42_vm0, %v694_v5  ;;  %1347 = vmatmul.mubr.msk.f32.vlgmr.msra.gmra.mxu1 %vm42_vm0, %v694_v5 }
 0xde8   :  { %1361 = vmatpush3.msra.mxu1 %v1528_v6  ;;  %1368 = vmatprep.mubr.msk.f32.mxu1 %vm1468_vm1, %v1467_v8 }
 0xde9   :  { %1362 = vmatprep.subr.mxu1 %v1467_v8 }
 0xdea   :  { %1363 = vmatpush3.msra.mxu1 %v1545_v11 }
 0xdeb   :  { %1364 = vmatprep.subr.mxu1 %v1467_v8 }
 0xdec   :  { %1365 = vmatpush3.msra.mxu1 %v1557_v13 }
 0xded   :  { %1366 = vmatprep.subr.mxu1 %v1467_v8 }
 0xdee   :  { %1367 = vmatpush3.msra.mxu1 %v1566_v14  ;;  %v1010_v38 = vld [vmem:[#allocation2 + $0x20] sm:$0xff] }
 0xea7   :  { %v765_v9 = vpop.f32.mrf.mxu1 }
 0xea8   :  { %v769_v6 = vadd.f32 %v765_v9, %v159_v7  ;;  %v169_v9 = vadd.f32 %v1597_v18, %v1602_v20 }
 0xea9   :  { %v1348_v10 = vpop.f32.mrf.mxu1 }
 0xeaa   :  { %v1185_v12 = vmul.f32 -1.442695, %v769_v6 }
 0xeac   :  { %1443 = vpow2.f32 %v1185_v12 }
 0xead   :  { %1445 = vtanh.f32 %v769_v6 }
 0xeb9   :  { %v1444_v17 = vpop.eup %1443 }
 0xeba   :  { %v774_v19 = vadd.f32 1.0, %v1444_v17  ;;  %v1446_v11 = vpop.eup %1445 }
 0xebc   :  { %1447 = vrcp.f32 %v774_v19 }
 0xec9   :  { %v1448_v22 = vpop.eup %1447 }
 0xeca   :  { %v777_v13 = vsel %vm1607_vm4, %v1446_v11, %v1448_v22 }
 0xecb   :  { %780 = vrot.lane.b32.xlu0 %v777_v13, %s1469_s3  ;;  %v778_v15 = vmul.f32 %v777_v13, %v685_v1 }
 0xf3d   :  { %v781_v8 = vpop.permute.xlu0 %780 }
 0xf3e   :  { %v783_v14 = vmul.f32 %v781_v8, %v777_v13 }
 0xf40   :  { %785 = vrot.lane.b32.xlu1 %v783_v14, %s1470_s25 }
 0xfb2   :  { %v786_v23 = vpop.permute.xlu1 %785 }
 0xfb3   :  { %v1720_v24 = vadd.f32 %v786_v23, %v778_v15 }
 0xfb5   :  { %1449 = vtanh.f32 %v1720_v24 }
 0xfc2   :  { %v1450_v26 = vpop.eup %1449 }
 0xfc3   :  { %791 = vrot.lane.b32.xlu0 %v1450_v26, %s1469_s3 }
0x1035   :  { %v792_v27 = vpop.permute.xlu0 %791 }
0x1036   :  { %v794_v28 = vmul.f32 %v792_v27, %v777_v13 }
0x1038   :  { %796 = vrot.lane.b32.xlu1 %v794_v28, %s1470_s25 }
0x10aa   :  { %v797_v29 = vpop.permute.xlu1 %796 }
0x10ab   :  { %799 = vst.msk [vmem:[#allocation2 + $0x28] sm:$0xff] %vm42_vm0, %v797_v29  ;;  %1358 = vmatmul.mubr.msk.f32.vlgmr.msra.gmra.mxu0 %vm42_vm0, %v797_v29 }
0x10ac   :  { %1372 = vmatpush3.msra.mxu0 %v1017_v25  ;;  %1379 = vmatprep.mubr.msk.f32.mxu0 %vm42_vm0, %v1006_v32 }
0x10ad   :  { %1373 = vmatprep.subr.mxu0 %v1016_v30 }
0x10ae   :  { %1374 = vmatpush3.msra.mxu0 %v1016_v30 }
0x10af   :  { %1375 = vmatprep.subr.mxu0 %v1015_v33 }
0x10b0   :  { %1376 = vmatpush3.msra.mxu0 %v1015_v33 }
0x10b1   :  { %1377 = vmatprep.subr.mxu0 %v1014_v34 }
0x10b2   :  { %1378 = vmatpush3.msra.mxu0 %v1014_v34  ;;  %v1011_v39 = vld [vmem:[#allocation2 + $0x28] sm:$0xff] }
0x10b3   :  { %1380 = vmatmul.mubr.msk.f32.vlgmr.msra.gmra.mxu0 %vm42_vm0, %v1007_v35 }
0x10b4   :  { %1382 = vmatprep.mubr.msk.f32.mxu0 %vm42_vm0, %v1008_v36 }
0x10b7   :  { %1383 = vmatmul.mubr.msk.f32.gmra.mxu0 %vm42_vm0, %v1009_v37 }
0x10b8   :  { %1385 = vmatprep.mubr.msk.f32.mxu0 %vm42_vm0, %v1010_v38 }
0x10bb   :  { %1386 = vmatmul.mubr.msk.f32.gmra.mxu0 %vm42_vm0, %v1011_v39 }
0x116b   :  { %v868_v41 = vpop.f32.mrf.mxu0 }
0x116c   :  { %v872_v42 = vadd.f32 %v868_v41, %v164_v40 }
0x116d   :  { %v1359_v43 = vpop.f32.mrf.mxu0 }
0x116e   :  { %v1187_v44 = vmul.f32 -1.442695, %v872_v42 }
0x1170   :  { %1451 = vpow2.f32 %v1187_v44 }
0x1171   :  { %1453 = vtanh.f32 %v872_v42 }
0x1173   :  { %v1381_v46 = vpop.f32.mrf.mxu0 }
0x1174   :  { %v1121_v47 = vadd.f32 %v1381_v46, %v1750_v45 }
0x1175   :  { %v1115_v48 = vpop.f32.mrf.mxu0 }
0x1176   :  { %1155 = vst [vmem:[%s1810_s6 + $0x8] sm:$0xff] %v1121_v47  ;;  %v1116_v21 = vadd.f32 %v1750_v45, %v1115_v48 }
0x1177   :  { %v1384_v49 = vpop.f32.mrf.mxu0 }
0x1178   :  { %1154 = vst [vmem:[%s1810_s6] sm:$0xff] %v1116_v21  ;;  %v1131_v50 = vadd.f32 %v1384_v49, %v1750_v45 }
0x1179   :  { %v1125_v51 = vpop.f32.mrf.mxu0 }
0x117a   :  { %1157 = vst [vmem:[%s1810_s6 + $0x18] sm:$0xff] %v1131_v50  ;;  %v1126_v52 = vadd.f32 %v1750_v45, %v1125_v51 }
0x117b   :  { %v1387_v53 = vpop.f32.mrf.mxu0 }
0x117c   :  { %1156 = vst [vmem:[%s1810_s6 + $0x10] sm:$0xff] %v1126_v52  ;;  %v1141_v54 = vadd.f32 %v1387_v53, %v1750_v45 }
0x117d   :  { %v1452_v55 = vpop.eup %1451  ;;  %v1135_v56 = vpop.f32.mrf.mxu0 }
0x117e   :  { %v877_v57 = vadd.f32 1.0, %v1452_v55  ;;  %1159 = vst [vmem:[%s1810_s6 + $0x28] sm:$0xff] %v1141_v54  ;;  %v1136_v58 = vadd.f32 %v1750_v45, %v1135_v56  ;;  %v1454_v59 = vpop.eup %1453 }
0x1180   :  { %1455 = vrcp.f32 %v877_v57  ;;  %1158 = vst [vmem:[%s1810_s6 + $0x20] sm:$0xff] %v1136_v58 }
0x118d   :  { %v1456_v60 = vpop.eup %1455 }
0x118e   :  { %v880_v61 = vsel %vm1607_vm4, %v1454_v59, %v1456_v60 }
0x118f   :  { %883 = vrot.lane.b32.xlu0 %v880_v61, %s1469_s3  ;;  %v881_v16 = vmul.f32 %v880_v61, %v1720_v24 }
0x1201   :  { %v884_v62 = vpop.permute.xlu0 %883 }
0x1202   :  { %v886_v63 = vmul.f32 %v884_v62, %v880_v61 }
0x1204   :  { %888 = vrot.lane.b32.xlu1 %v886_v63, %s1470_s25 }
0x1276   :  { %v889_v0 = vpop.permute.xlu1 %888 }
0x1277   :  { %v891_v1 = vadd.f32 %v889_v0, %v881_v16 }
0x1279   :  { %1457 = vtanh.f32 %v891_v1 }
0x1286   :  { %v1458_v2 = vpop.eup %1457 }
0x1287   :  { %894 = vrot.lane.b32.xlu0 %v1458_v2, %s1469_s3 }
0x12f9   :  { %v895_v3 = vpop.permute.xlu0 %894 }
0x12fa   :  { %v897_v4 = vmul.f32 %v895_v3, %v880_v61 }
0x12fc   :  { %899 = vrot.lane.b32.xlu1 %v897_v4, %s1470_s25 }
0x136e   :  { %v900_v5 = vpop.permute.xlu1 %899 }
0x136f   :  { %902 = vst.msk [vmem:[#allocation2 + $0x30] sm:$0xff] %vm42_vm0, %v900_v5  ;;  %1369 = vmatmul.mubr.msk.f32.vlgmr.msra.gmra.mxu1 %vm42_vm0, %v900_v5 }
0x1376   :  { %v1012_v7 = vld [vmem:[#allocation2 + $0x30] sm:$0xff] }
0x1377   :  { %1388 = vmatprep.mubr.msk.f32.mxu0 %vm42_vm0, %v1012_v7 }
0x142f   :  { %v971_v6 = vpop.f32.mrf.mxu1 }
0x1430   :  { %v975_v10 = vadd.f32 %v971_v6, %v169_v9 }
0x1431   :  { %v1370_v12 = vpop.f32.mrf.mxu1 }
0x1432   :  { %v1189_v17 = vmul.f32 -1.442695, %v975_v10 }
0x1434   :  { %1459 = vpow2.f32 %v1189_v17 }
0x1435   :  { %1461 = vtanh.f32 %v975_v10 }
0x1441   :  { %v1460_v19 = vpop.eup %1459 }
0x1442   :  { %v980_v11 = vadd.f32 1.0, %v1460_v19  ;;  %v1462_v22 = vpop.eup %1461 }
0x1444   :  { %1463 = vrcp.f32 %v980_v11 }
0x1451   :  { %v1464_v13 = vpop.eup %1463 }
0x1452   :  { %v983_v8 = vsel %vm1607_vm4, %v1462_v22, %v1464_v13 }
0x1453   :  { %986 = vrot.lane.b32.xlu0 %v983_v8, %s1469_s3  ;;  %v984_v18 = vmul.f32 %v983_v8, %v891_v1 }
0x14c5   :  { %v987_v14 = vpop.permute.xlu0 %986 }
0x14c6   :  { %v989_v15 = vmul.f32 %v987_v14, %v983_v8 }
0x14c8   :  { %991 = vrot.lane.b32.xlu1 %v989_v15, %s1470_s25 }
0x153a   :  { %v992_v20 = vpop.permute.xlu1 %991 }
0x153b   :  { %v994_v23 = vadd.f32 %v992_v20, %v984_v18 }
0x153d   :  { %1465 = vtanh.f32 %v994_v23 }
0x154a   :  { %v1466_v24 = vpop.eup %1465 }
0x154b   :  { %997 = vrot.lane.b32.xlu0 %v1466_v24, %s1469_s3 }
0x15bd   :  { %v998_v25 = vpop.permute.xlu0 %997 }
0x15be   :  { %v1000_v26 = vmul.f32 %v998_v25, %v983_v8 }
0x15c0   :  { %1002 = vrot.lane.b32.xlu1 %v1000_v26, %s1470_s25 }
0x1632   :  { %v1003_v27 = vpop.permute.xlu1 %1002 }
0x1633   :  { %1005 = vst.msk [vmem:[#allocation2 + $0x38] sm:$0xff] %vm42_vm0, %v1003_v27 }
0x163a   :  { %v1013_v31 = vld [vmem:[#allocation2 + $0x38] sm:$0xff] }
0x163b   :  { %1389 = vmatmul.mubr.msk.f32.gmra.mxu0 %vm42_vm0, %v1013_v31 }
0x16fb   :  { %v1390_v28 = vpop.f32.mrf.mxu0 }
0x16fc   :  { %v1151_v29 = vadd.f32 %v1390_v28, %v1750_v45 }
0x16fd   :  { %v1145_v30 = vpop.f32.mrf.mxu0 }
0x16fe   :  { %1161 = vst [vmem:[%s1810_s6 + $0x38] sm:$0xff] %v1151_v29  ;;  %v1146_v32 = vadd.f32 %v1750_v45, %v1145_v30 }
0x1700   :  { %1160 = vst [vmem:[%s1810_s6 + $0x30] sm:$0xff] %v1146_v32 }

</bundles_post_ra>
